<compile_context>
chip_gen: v5e
topology: v5e:2x2
jax: 0.10.0
libtpu: 0.0.40
codegen_flags: <defaults>
</compile_context>

<pallas_src>
import functools

import jax
import jax.numpy as jnp
from jax import lax
from jax.experimental import pallas as pl
from jax.experimental.pallas import tpu as pltpu


def _embed_kernel(ids_ref, w_ref, *rest, vocab, dropout_rate, train):
    """One grid step: gather T embedding rows + (optional) inverted dropout."""
    use_dropout = train and dropout_rate > 0.0
    o_ref = rest[-1]
    bits_ref = rest[0] if use_dropout else None

    ids = ids_ref[...]                                        # (T, 1) int32
    T = ids.shape[0]

    # One-hot gather on the MXU: (T, V) x (V, D) -> (T, D), exact row select.
    iota = lax.broadcasted_iota(jnp.int32, (T, vocab), 1)
    one_hot = (ids == iota).astype(w_ref.dtype)               # (T, V)
    rows = jnp.dot(one_hot, w_ref[...],
                   preferred_element_type=jnp.float32)        # (T, D) f32

    if use_dropout:
        # keep iff bits >= round(p * 2^32)  (integer compare, no f32 convert)
        thresh = min(int(round(dropout_rate * 4294967296.0)), 4294967295)
        keep = bits_ref[...] >= jnp.uint32(thresh)
        rows = jnp.where(keep, rows * (1.0 / (1.0 - dropout_rate)),
                         jnp.zeros_like(rows))

    o_ref[...] = rows.astype(o_ref.dtype)


def embed_forward(X, weight, *, dropout_rate=0.1, train=False, key=None,
                  block_tokens=256):
    """Pallas equivalent of Embed.forward.

    X:      (batch, seq) integer token ids.
    weight: (vocab, emb_dim) embedding table (row 0 is the padding row, as in
            nn.Embedding(padding_idx=0) it is zeroed at init).
    Returns (batch, seq, emb_dim) in weight.dtype.
    """
    B, S = X.shape
    V, D = weight.shape
    N = B * S

    # Tokens per grid step: multiple of 8 sublanes, capped at block_tokens.
    T = min(int(block_tokens), max(8, -(-N // 8) * 8))
    n_blocks = -(-N // T)
    N_pad = n_blocks * T

    ids = X.reshape(-1).astype(jnp.int32)
    if N_pad != N:
        ids = jnp.pad(ids, (0, N_pad - N))          # pad with padding id 0
    ids2 = ids.reshape(N_pad, 1)

    use_dropout = train and dropout_rate > 0.0

    args = [ids2, weight]
    in_specs = [
        pl.BlockSpec((T, 1), lambda i: (i, 0)),     # token ids for this block
        pl.BlockSpec((V, D), lambda i: (0, 0)),     # VMEM-resident table
    ]
    itemsize = jnp.dtype(weight.dtype).itemsize
    bytes_accessed = N_pad * 4 + V * D * itemsize + N_pad * D * itemsize
    if use_dropout:
        if key is None:
            key = jax.random.PRNGKey(0)
        bits = jax.random.bits(key, (N_pad, D), dtype=jnp.uint32)
        args.append(bits)
        in_specs.append(pl.BlockSpec((T, D), lambda i: (i, 0)))
        bytes_accessed += N_pad * D * 4

    # VMEM budget: 2x table (double-buffer worst case) + blocked ids/bits/out.
    table_bytes = V * D * itemsize
    block_bytes = 2 * T * D * itemsize + 2 * T * 4
    if use_dropout:
        block_bytes += 2 * T * D * 4
    vmem_needed = 2 * table_bytes + block_bytes + (1 << 20)
    assert vmem_needed <= 48 * 1024 * 1024, (
        "Embedding table too large for the VMEM-resident fast path.")

    kernel = functools.partial(
        _embed_kernel, vocab=V,
        dropout_rate=float(dropout_rate), train=bool(train))

    out = pl.pallas_call(
        kernel,
        out_shape=jax.ShapeDtypeStruct((N_pad, D), weight.dtype),
        grid=(n_blocks,),
        in_specs=in_specs,
        out_specs=pl.BlockSpec((T, D), lambda i: (i, 0)),
        compiler_params=pltpu.CompilerParams(
            dimension_semantics=("parallel",),
            vmem_limit_bytes=int(max(vmem_needed, 32 * 1024 * 1024)),
        ),
        cost_estimate=pl.CostEstimate(
            flops=2 * N_pad * V * D,
            transcendentals=0,
            bytes_accessed=int(bytes_accessed),
        ),
    )(*args)

    return out[:N].reshape(B, S, D)


if __name__ == "__main__":
    # Small shapes consistent with Embed(length, emb_dim).
    vocab = 16       # `length`
    emb_dim = 128    # embedding_dim (lane-friendly)
    batch, seq = 2, 8

    key = jax.random.PRNGKey(0)
    k_w, k_x, k_d = jax.random.split(key, 3)

    # nn.Embedding(padding_idx=0) zeroes row 0 at init.
    weight = jax.random.normal(k_w, (vocab, emb_dim), dtype=jnp.float32)
    weight = weight.at[0].set(0.0)

    X = jax.random.randint(k_x, (batch, seq), 0, vocab, dtype=jnp.int32)
    X = X.at[0, 0].set(0)  # exercise the padding row

    # Eval mode (dropout = identity): must match a plain gather.
    out_eval = embed_forward(X, weight, dropout_rate=0.1, train=False)
    jax.block_until_ready(out_eval)
    ref = jnp.take(weight, X, axis=0)
    assert out_eval.shape == (batch, seq, emb_dim)
    assert jnp.allclose(out_eval, ref, atol=1e-6), "eval-mode mismatch vs gather"

    # Train mode: inverted dropout -> every element is 0 or ref/(1-p).
    p = 0.1
    out_train = embed_forward(X, weight, dropout_rate=p, train=True, key=k_d)
    jax.block_until_ready(out_train)
    assert out_train.shape == (batch, seq, emb_dim)
    scaled = ref / (1.0 - p)
    is_zero = jnp.isclose(out_train, 0.0, atol=1e-6)
    is_scaled = jnp.isclose(out_train, scaled, atol=1e-5, rtol=1e-5)
    assert bool(jnp.all(is_zero | is_scaled)), "train-mode values must be 0 or ref/(1-p)"
    nz_ref = ~jnp.isclose(ref, 0.0, atol=1e-6)
    drop_frac = jnp.sum(is_zero & nz_ref) / jnp.maximum(jnp.sum(nz_ref), 1)
    assert 0.0 < float(drop_frac) < 0.5, f"implausible drop fraction {float(drop_frac)}"

    print("KERNEL_OK")
</pallas_src>

<mosaic_0001>
module attributes {stable_mosaic.version = 11 : i64} {
  func.func @_embed_kernel(%arg0: i32, %arg1: memref<16x1xi32, #tpu.memory_space<vmem>>, %arg2: memref<16x128xf32, #tpu.memory_space<vmem>>, %arg3: memref<16x128xf32, #tpu.memory_space<vmem>>) attributes {dimension_semantics = [#tpu.dimension_semantics<parallel>], iteration_bounds = array<i64: 1>, scalar_prefetch = 0 : i64, scratch_operands = 0 : i64, tpu.core_type = #tpu.core_type<tc>, window_params = [{transform_indices = @transform_0, window_bounds = array<i64: 16, 1>}, {pipeline_mode = #tpu.pipeline_mode<synchronous>, transform_indices = @transform_1, window_bounds = array<i64: 16, 128>}, {transform_indices = @transform_2, window_bounds = array<i64: 16, 128>}]} {
    %c0 = arith.constant 0 : index
    %c0_0 = arith.constant 0 : index
    %0 = vector.load %arg1[%c0, %c0_0] : memref<16x1xi32, #tpu.memory_space<vmem>>, vector<16x1xi32>
    %1 = tpu.iota {dimensions = array<i32: 1>} : vector<16x16xi32>
    %2 = vector.broadcast %0 : vector<16x1xi32> to vector<16x16xi32>
    %3 = arith.cmpi eq, %2, %1 : vector<16x16xi32>
    %4 = arith.extui %3 : vector<16x16xi1> to vector<16x16xi32>
    %5 = arith.sitofp %4 : vector<16x16xi32> to vector<16x16xf32>
    %c0_1 = arith.constant 0 : index
    %c0_2 = arith.constant 0 : index
    %6 = vector.load %arg2[%c0_1, %c0_2] : memref<16x128xf32, #tpu.memory_space<vmem>>, vector<16x128xf32>
    %cst = arith.constant dense<0.000000e+00> : vector<16x128xf32>
    %7 = tpu.matmul %5, %6, %cst {dimension_numbers = #tpu.dot_dimension_numbers<[1], [0], [0], [1], [0, 0, 1, 1], [], []>} : vector<16x16xf32>, vector<16x128xf32>, vector<16x128xf32> -> vector<16x128xf32>
    %c0_3 = arith.constant 0 : index
    %c0_4 = arith.constant 0 : index
    %8 = vector.load %arg3[%c0_3, %c0_4] : memref<16x128xf32, #tpu.memory_space<vmem>>, vector<16x128xf32>
    tpu.vector_store %arg3[%c0_3, %c0_4], %7 {strides = array<i32>} : memref<16x128xf32, #tpu.memory_space<vmem>>, vector<16x128xf32>,
    return
  }
  func.func @transform_0(%arg0: i32) -> (i32, i32) {
    %c0_i32 = arith.constant 0 : i32
    %c0_i32_0 = arith.constant 0 : i32
    return %arg0, %c0_i32 : i32, i32
  }
  func.func @transform_1(%arg0: i32) -> (i32, i32) {
    %c0_i32 = arith.constant 0 : i32
    %c0_i32_0 = arith.constant 0 : i32
    %c0_i32_1 = arith.constant 0 : i32
    return %c0_i32, %c0_i32_0 : i32, i32
  }
  func.func @transform_2(%arg0: i32) -> (i32, i32) {
    %c0_i32 = arith.constant 0 : i32
    %c0_i32_0 = arith.constant 0 : i32
    return %arg0, %c0_i32 : i32, i32
  }
}

</mosaic_0001>

<bundles_post_ra>
// kernel: tpu_custom_call.1
= control target key start
LH: loop header
LB: loop body
LE: loop exit
PB: predicated region body
PF: predicated region fallthrough
CT: control target
= control target key end

     0   :  { %v118_v2 = vmov 0   ;;  %s153_s0 = inlined_call_operand.vmem [shape: s32[16,1], index: 0, kind: input, shape index: {}]   ;;  %s154_s1 = inlined_call_operand.vmem [shape: f32[16,128], index: 1, kind: input, shape index: {}]   ;;  %s155_s2 = inlined_call_operand.hbm [shape: f32[16,128], index: 2, kind: output, shape index: {}]  }
   0x1   :  { %v12_v0 = vld [vmem:[%s153_s0] sm:$0xff]  ;;  %v29_v1 = vld [vmem:[%s154_s1 + $0x8] sm:$0xff]  ;;  %91 = vset.pattern.permute.xlu0 %v118_v2 }
   0x2   :  { %51 = vmatpush.msra.mxu0 %v29_v1 }
   0x3   :  { %7 = vsyncpa [#allocation3], 0  ;;  %17 = vperm.xlu0 %91, %v12_v0   ;;  %84 = vmatpush.msra.mxu1 %v29_v1  ;;  %v13_v3 = vld [vmem:[%s153_s0 + $0x8] sm:$0xff]  ;;  %v28_v4 = vld [vmem:[%s154_s1] sm:$0xff]  ;;  %v14_v5 = vlaneseq  ;;  %vm30_vm0 = vcmask 130048   ;;  %v119_v8 = vmov 0.0  }
   0x4   :  { %52 = vmatpush.msra.mxu0 %v28_v4  ;;  %s120_s0 = smov [#allocation2]   ;;  %s68_s19 = sshll.u32 %s155_s2, 4  ;;  %s69_s19 = int_to_ptr.hbm [resolvable:$true] %s68_s19 }
   0x5   :  { %85 = vmatpush.msra.mxu1 %v28_v4  ;;  %v15_v6 = vand.u32 127, %v14_v5  ;;  %s66_s17 = sshll.u32 %s120_s0, 4  ;;  %s121_s20 = smov 128   ;;  %s67_s17 = int_to_ptr.vmem [resolvable:$true] %s66_s17 }
   0x6   :  { %s122_s21 = smov 8  }
   0xb   :  { %20 = vperm.xlu0 %91, %v13_v3  }
  0x75   :  { %v18_v7 = vpop.permute.xlu0 %17 }
  0x76   :  { %vm22_vm1 = vcmp.eq.s32.totalorder %v18_v7, %v15_v6 }
  0x77   :  { %v80_v9 = vsel %vm22_vm1, 1.0, %v119_v8 }
  0x78   :  { %82 = vmatmul.msk.f32.vlgmr.msra.gmra.mxu0 %vm30_vm0, %v80_v9 }
  0x7d   :  { %v21_v10 = vpop.permute.xlu0 %20 }
  0x7e   :  { %vm23_vm2 = vcmp.eq.s32.totalorder %v21_v10, %v15_v6 }
  0x7f   :  { %v81_v11 = vsel %vm23_vm2, 1.0, %v119_v8 }
  0x80   :  { %83 = vmatmul.msk.f32.vlgmr.msra.gmra.mxu1 %vm30_vm0, %v81_v11 }
  0xf5   :  { %v54_v12 = vpop.f32.mrf.mxu0 }
  0xf6   :  { %60 = vst [vmem:[#allocation2] sm:$0xff] %v54_v12 }
  0xfd   :  { %v57_v13 = vpop.f32.mrf.mxu1 }
  0xfe   :  { %61 = vst [vmem:[#allocation2 + $0x8] sm:$0xff] %v57_v13 }
  0xff   :  { %74 = dma.vmem_to_hbm [thread:$0]  %s67_s17, 256, %s69_s19, [#allocation3], %s121_s20, %s121_s20, %s122_s21  }
 0x100   :  { %116 = dma.done.wait [#allocation3], 256  }
 0x101   :  { %117 = vsyncadd [#allocation3], 4294967040 }
 0x102   :  { %79 = vsyncpa [#allocation3], 1 }

</bundles_post_ra>
